<compile_context>
chip_gen: v5e
topology: v5e:2x2
jax: 0.10.0
libtpu: 0.0.40
codegen_flags: <defaults>
</compile_context>

<pallas_src>
import jax
import jax.numpy as jnp
from jax.experimental import pallas as pl
from jax.experimental.pallas import tpu as pltpu

HIDDEN = 64
TILE_N = 1024   # token rows per grid step
LANE = 128


def _round_up(x, m):
    return (x + m - 1) // m * m


def _bigram_logits_kernel(tok_ref, table_ref, logits_ref):
    """Inference: gather logits rows from the fused (V, V) table via a one-hot MXU matmul."""
    tn = tok_ref.shape[0]
    v = table_ref.shape[1]
    vocab_iota = jax.lax.broadcasted_iota(jnp.int32, (tn, v), 1)
    onehot = (vocab_iota == tok_ref[...]).astype(jnp.float32)            # (tn, V)
    logits = jnp.dot(onehot, table_ref[...],
                     preferred_element_type=jnp.float32)                 # (tn, V)
    logits_ref[...] = logits.astype(logits_ref.dtype)


def _bigram_loss_kernel(tok_ref, tgt_ref, table_ref, lse_ref, logits_ref, loss_ref):
    """Training: logits + per-row CE.  LSE precomputed in the wrapper; no in-kernel exp/log."""
    tn = tok_ref.shape[0]
    v = table_ref.shape[1]
    vocab_iota = jax.lax.broadcasted_iota(jnp.int32, (tn, v), 1)

    onehot = (vocab_iota == tok_ref[...]).astype(jnp.float32)            # (tn, V)
    logits = jnp.dot(onehot, table_ref[...],
                     preferred_element_type=jnp.float32)                 # (tn, V)
    logits_ref[...] = logits.astype(logits_ref.dtype)

    tgt = tgt_ref[...]                                                   # (tn, 1)
    valid = (tgt >= 0).astype(jnp.float32)                               # padded rows -> 0
    tgt_onehot = (vocab_iota == tgt).astype(jnp.float32)                 # (tn, V)
    # per-row loss = lse[tok] - logits[tgt]; one fused XLU reduce (other lanes are 0).
    lse_minus_tgt = jnp.sum(onehot * lse_ref[...] - tgt_onehot * logits,
                            axis=-1, keepdims=True)                      # (tn, 1)
    loss_ref[...] = lse_minus_tgt * valid


def _bigram_loss_only_kernel(tok_ref, tgt_ref, table_ref, lse_ref, loss_ref):
    """Loss-only: identical math, but skips the (N, V) logits HBM writeback entirely."""
    tn = tok_ref.shape[0]
    v = table_ref.shape[1]
    vocab_iota = jax.lax.broadcasted_iota(jnp.int32, (tn, v), 1)

    onehot = (vocab_iota == tok_ref[...]).astype(jnp.float32)
    logits = jnp.dot(onehot, table_ref[...], preferred_element_type=jnp.float32)

    tgt = tgt_ref[...]
    valid = (tgt >= 0).astype(jnp.float32)
    tgt_onehot = (vocab_iota == tgt).astype(jnp.float32)
    lse_minus_tgt = jnp.sum(onehot * lse_ref[...] - tgt_onehot * logits,
                            axis=-1, keepdims=True)
    loss_ref[...] = lse_minus_tgt * valid


def bigram_forward(params, inputs, targets=None, *, tile_n=TILE_N,
                   logits_dtype=jnp.float32, loss_only=False):
    """Matches BigramLanguageModel.forward: returns (logits (B,T,V), loss or None)."""
    emb, w_t, b = params["emb"], params["w_t"], params["b"]
    V = emb.shape[0]
    B, T = inputs.shape
    N = B * T

    # Fuse embedding + linear once: the logits row for token t is table[t].
    table = (emb @ w_t + b).astype(jnp.float32)                          # (V, V)
    # Per-row LSE (== per-token LSE after the exact one-hot gather), hoisted out of kernel.
    row_lse = jax.scipy.special.logsumexp(table, axis=-1)[None, :]       # (1, V)

    # Lane-align the vocab (dense vst stores); pad rows/cols with zeros (never gathered /
    # never targeted; padded logits columns are sliced off below).
    V_pad = _round_up(V, LANE)
    if V_pad != V:
        table = jnp.pad(table, ((0, V_pad - V), (0, V_pad - V)))
        row_lse = jnp.pad(row_lse, ((0, 0), (0, V_pad - V)))

    # Sublane-aligned row tile; pad the flattened token stream up to a tile multiple.
    tn = min(tile_n, _round_up(N, 8))
    n_pad = _round_up(N, tn)
    g = n_pad // tn

    tok = jnp.pad(inputs.reshape(-1).astype(jnp.int32), (0, n_pad - N))
    tok = tok.reshape(n_pad, 1)

    tok_spec = pl.BlockSpec((tn, 1), lambda i: (i, 0))
    table_spec = pl.BlockSpec((V_pad, V_pad), lambda i: (0, 0))
    lse_spec = pl.BlockSpec((1, V_pad), lambda i: (0, 0))
    logits_spec = pl.BlockSpec((tn, V_pad), lambda i: (i, 0))
    loss_spec = pl.BlockSpec((tn, 1), lambda i: (i, 0))

    logits_itemsize = jnp.dtype(logits_dtype).itemsize
    gather_flops = 2 * n_pad * V_pad * V_pad

    if targets is None:
        logits_flat = pl.pallas_call(
            _bigram_logits_kernel,
            out_shape=jax.ShapeDtypeStruct((n_pad, V_pad), logits_dtype),
            grid=(g,),
            in_specs=[tok_spec, table_spec],
            out_specs=logits_spec,
            compiler_params=pltpu.CompilerParams(
                dimension_semantics=("parallel",)),
            cost_estimate=pl.CostEstimate(
                flops=gather_flops, transcendentals=0,
                bytes_accessed=4 * (n_pad + V_pad * V_pad)
                + n_pad * V_pad * logits_itemsize),
        )(tok, table)
        return logits_flat[:N, :V].reshape(B, T, V).astype(logits_dtype), None

    tgt = jnp.pad(targets.reshape(-1).astype(jnp.int32), (0, n_pad - N),
                  constant_values=-1)
    tgt = tgt.reshape(n_pad, 1)

    if loss_only:
        loss_rows = pl.pallas_call(
            _bigram_loss_only_kernel,
            out_shape=jax.ShapeDtypeStruct((n_pad, 1), jnp.float32),
            grid=(g,),
            in_specs=[tok_spec, tok_spec, table_spec, lse_spec],
            out_specs=loss_spec,
            compiler_params=pltpu.CompilerParams(
                dimension_semantics=("parallel",)),
            cost_estimate=pl.CostEstimate(
                flops=gather_flops, transcendentals=0,
                bytes_accessed=4 * (3 * n_pad + V_pad * V_pad + V_pad)),
        )(tok, tgt, table, row_lse)
        loss = jnp.sum(loss_rows[:N, 0]) / N
        return None, loss

    logits_flat, loss_rows = pl.pallas_call(
        _bigram_loss_kernel,
        out_shape=(
            jax.ShapeDtypeStruct((n_pad, V_pad), logits_dtype),
            jax.ShapeDtypeStruct((n_pad, 1), jnp.float32),
        ),
        grid=(g,),
        in_specs=[tok_spec, tok_spec, table_spec, lse_spec],
        out_specs=(logits_spec, loss_spec),
        compiler_params=pltpu.CompilerParams(
            dimension_semantics=("parallel",)),      # per-row losses: no cross-step dep
        cost_estimate=pl.CostEstimate(
            flops=gather_flops, transcendentals=0,
            bytes_accessed=4 * (3 * n_pad + V_pad * V_pad + V_pad)
            + n_pad * V_pad * logits_itemsize),
    )(tok, tgt, table, row_lse)

    loss = jnp.sum(loss_rows[:N, 0]) / N
    return logits_flat[:N, :V].reshape(B, T, V).astype(logits_dtype), loss


def init_params(vocab_size, key):
    k_emb, k_w, k_b = jax.random.split(key, 3)
    # nn.Embedding: N(0, 1); nn.Linear: U(-1/sqrt(fan_in), 1/sqrt(fan_in))
    bound = 1.0 / (HIDDEN ** 0.5)
    emb = jax.random.normal(k_emb, (vocab_size, HIDDEN), jnp.float32)
    w = jax.random.uniform(k_w, (vocab_size, HIDDEN), jnp.float32, -bound, bound)
    b = jax.random.uniform(k_b, (vocab_size,), jnp.float32, -bound, bound)
    return {"emb": emb, "w_t": w.T, "b": b.reshape(1, vocab_size)}


if __name__ == "__main__":
    vocab_size = 65    # char-level vocab; deliberately NOT lane-aligned (exercises padding)
    B, T = 2, 8

    key = jax.random.PRNGKey(0)
    k_params, k_in, k_tg = jax.random.split(key, 3)
    params = init_params(vocab_size, k_params)

    inputs = jax.random.randint(k_in, (B, T), 0, vocab_size, jnp.int32)
    targets = jax.random.randint(k_tg, (B, T), 0, vocab_size, jnp.int32)

    # Training-style call (logits + loss).
    logits, loss = bigram_forward(params, inputs, targets)
    jax.block_until_ready((logits, loss))

    # Pure-JAX reference check.
    ref_logits = params["emb"][inputs] @ params["w_t"] + params["b"][0]
    flat = ref_logits.reshape(-1, vocab_size)
    ref_lse = jax.scipy.special.logsumexp(flat, axis=-1)
    ref_tgt = jnp.take_along_axis(flat, targets.reshape(-1, 1), axis=-1)[:, 0]
    ref_loss = jnp.mean(ref_lse - ref_tgt)

    assert logits.shape == (B, T, vocab_size)
    assert jnp.allclose(logits, ref_logits, atol=1e-4), "logits mismatch"
    assert jnp.allclose(loss, ref_loss, atol=1e-4), "loss mismatch"

    # Inference-style call (targets=None path: no CE work).
    logits2, loss2 = bigram_forward(params, inputs, None)
    jax.block_until_ready(logits2)
    assert loss2 is None
    assert jnp.allclose(logits2, ref_logits, atol=1e-4), "inference logits mismatch"

    # Loss-only path (skips the logits HBM writeback entirely).
    logits3, loss3 = bigram_forward(params, inputs, targets, loss_only=True)
    jax.block_until_ready(loss3)
    assert logits3 is None
    assert jnp.allclose(loss3, ref_loss, atol=1e-4), "loss-only mismatch"

    print("KERNEL_OK")
</pallas_src>

<mosaic_0001>
module attributes {stable_mosaic.version = 11 : i64} {
  func.func @_bigram_loss_kernel(%arg0: i32, %arg1: memref<16x1xi32, #tpu.memory_space<vmem>>, %arg2: memref<16x1xi32, #tpu.memory_space<vmem>>, %arg3: memref<128x128xf32, #tpu.memory_space<vmem>>, %arg4: memref<1x128xf32, #tpu.memory_space<vmem>>, %arg5: memref<16x128xf32, #tpu.memory_space<vmem>>, %arg6: memref<16x1xf32, #tpu.memory_space<vmem>>) attributes {dimension_semantics = [#tpu.dimension_semantics<parallel>], iteration_bounds = array<i64: 1>, scalar_prefetch = 0 : i64, scratch_operands = 0 : i64, tpu.core_type = #tpu.core_type<tc>, window_params = [{transform_indices = @transform_0, window_bounds = array<i64: 16, 1>}, {transform_indices = @transform_1, window_bounds = array<i64: 16, 1>}, {pipeline_mode = #tpu.pipeline_mode<synchronous>, transform_indices = @transform_2, window_bounds = array<i64: 128, 128>}, {pipeline_mode = #tpu.pipeline_mode<synchronous>, transform_indices = @transform_3, window_bounds = array<i64: 1, 128>}, {transform_indices = @transform_4, window_bounds = array<i64: 16, 128>}, {transform_indices = @transform_5, window_bounds = array<i64: 16, 1>}]} {
    %0 = tpu.iota {dimensions = array<i32: 1>} : vector<16x128xi32>
    %c0 = arith.constant 0 : index
    %c0_0 = arith.constant 0 : index
    %1 = vector.load %arg1[%c0, %c0_0] : memref<16x1xi32, #tpu.memory_space<vmem>>, vector<16x1xi32>
    %2 = vector.broadcast %1 : vector<16x1xi32> to vector<16x128xi32>
    %3 = arith.cmpi eq, %0, %2 : vector<16x128xi32>
    %4 = arith.extui %3 : vector<16x128xi1> to vector<16x128xi32>
    %5 = arith.sitofp %4 : vector<16x128xi32> to vector<16x128xf32>
    %c0_1 = arith.constant 0 : index
    %c0_2 = arith.constant 0 : index
    %6 = vector.load %arg3[%c0_1, %c0_2] : memref<128x128xf32, #tpu.memory_space<vmem>>, vector<128x128xf32>
    %cst = arith.constant dense<0.000000e+00> : vector<16x128xf32>
    %7 = tpu.matmul %5, %6, %cst {dimension_numbers = #tpu.dot_dimension_numbers<[1], [0], [0], [1], [0, 0, 1, 1], [], []>} : vector<16x128xf32>, vector<128x128xf32>, vector<16x128xf32> -> vector<16x128xf32>
    %c0_3 = arith.constant 0 : index
    %c0_4 = arith.constant 0 : index
    %8 = vector.load %arg5[%c0_3, %c0_4] : memref<16x128xf32, #tpu.memory_space<vmem>>, vector<16x128xf32>
    tpu.vector_store %arg5[%c0_3, %c0_4], %7 {strides = array<i32>} : memref<16x128xf32, #tpu.memory_space<vmem>>, vector<16x128xf32>,
    %c0_5 = arith.constant 0 : index
    %c0_6 = arith.constant 0 : index
    %9 = vector.load %arg2[%c0_5, %c0_6] : memref<16x1xi32, #tpu.memory_space<vmem>>, vector<16x1xi32>
    %c0_i32 = arith.constant 0 : i32
    %10 = vector.broadcast %c0_i32 : i32 to vector<16x1xi32>
    %11 = arith.cmpi sge, %9, %10 : vector<16x1xi32>
    %12 = arith.extui %11 : vector<16x1xi1> to vector<16x1xi32>
    %13 = arith.sitofp %12 : vector<16x1xi32> to vector<16x1xf32>
    %14 = vector.broadcast %9 : vector<16x1xi32> to vector<16x128xi32>
    %15 = arith.cmpi eq, %0, %14 : vector<16x128xi32>
    %16 = arith.extui %15 : vector<16x128xi1> to vector<16x128xi32>
    %17 = arith.sitofp %16 : vector<16x128xi32> to vector<16x128xf32>
    %c0_7 = arith.constant 0 : index
    %c0_8 = arith.constant 0 : index
    %18 = vector.load %arg4[%c0_7, %c0_8] : memref<1x128xf32, #tpu.memory_space<vmem>>, vector<1x128xf32>
    %19 = vector.broadcast %18 : vector<1x128xf32> to vector<16x128xf32>
    %20 = arith.mulf %5, %19 : vector<16x128xf32>
    %21 = arith.mulf %17, %7 : vector<16x128xf32>
    %22 = arith.subf %20, %21 : vector<16x128xf32>
    %cst_9 = arith.constant dense<0.000000e+00> : vector<16xf32>
    %23 = vector.multi_reduction <add>, %22, %cst_9 [1] : vector<16x128xf32> to vector<16xf32>
    %24 = vector.shape_cast %23 : vector<16xf32> to vector<16x1xf32>
    %25 = arith.mulf %24, %13 : vector<16x1xf32>
    %c0_10 = arith.constant 0 : index
    %c0_11 = arith.constant 0 : index
    %26 = vector.load %arg6[%c0_10, %c0_11] : memref<16x1xf32, #tpu.memory_space<vmem>>, vector<16x1xf32>
    tpu.vector_store %arg6[%c0_10, %c0_11], %25 {strides = array<i32>} : memref<16x1xf32, #tpu.memory_space<vmem>>, vector<16x1xf32>,
    return
  }
  func.func @transform_0(%arg0: i32) -> (i32, i32) {
    %c0_i32 = arith.constant 0 : i32
    %c0_i32_0 = arith.constant 0 : i32
    return %arg0, %c0_i32 : i32, i32
  }
  func.func @transform_1(%arg0: i32) -> (i32, i32) {
    %c0_i32 = arith.constant 0 : i32
    %c0_i32_0 = arith.constant 0 : i32
    return %arg0, %c0_i32 : i32, i32
  }
  func.func @transform_2(%arg0: i32) -> (i32, i32) {
    %c0_i32 = arith.constant 0 : i32
    %c0_i32_0 = arith.constant 0 : i32
    %c0_i32_1 = arith.constant 0 : i32
    return %c0_i32, %c0_i32_0 : i32, i32
  }
  func.func @transform_3(%arg0: i32) -> (i32, i32) {
    %c0_i32 = arith.constant 0 : i32
    %c0_i32_0 = arith.constant 0 : i32
    %c0_i32_1 = arith.constant 0 : i32
    return %c0_i32, %c0_i32_0 : i32, i32
  }
  func.func @transform_4(%arg0: i32) -> (i32, i32) {
    %c0_i32 = arith.constant 0 : i32
    %c0_i32_0 = arith.constant 0 : i32
    return %arg0, %c0_i32 : i32, i32
  }
  func.func @transform_5(%arg0: i32) -> (i32, i32) {
    %c0_i32 = arith.constant 0 : i32
    %c0_i32_0 = arith.constant 0 : i32
    return %arg0, %c0_i32 : i32, i32
  }
}

</mosaic_0001>

<bundles_post_ra>
// kernel: tpu_custom_call.1
= control target key start
LH: loop header
LB: loop body
LE: loop exit
PB: predicated region body
PF: predicated region fallthrough
CT: control target
= control target key end

     0   :  { %11 = vsyncpa [#allocation3], 0  ;;  %s313_s0 = inlined_call_operand.vmem [shape: s32[16,1], index: 0, kind: input, shape index: {}]   ;;  %s314_s1 = inlined_call_operand.vmem [shape: s32[16,1], index: 1, kind: input, shape index: {}]   ;;  %s315_s2 = inlined_call_operand.hbm [shape: f32[128,128], index: 2, kind: input, shape index: {}]   ;;  %s316_s3 = inlined_call_operand.vmem [shape: f32[1,128], index: 3, kind: input, shape index: {}]   ;;  %s317_s4 = inlined_call_operand.hbm [shape: f32[16,128], index: 4, kind: output, shape index: {0}]   ;;  %s318_s5 = inlined_call_operand.vmem [shape: f32[16,1], index: 5, kind: output, shape index: {1}]  }
   0x1   :  { %12 = vsyncpa [#allocation4], 0  ;;  %s21_s20 = sshll.u32 %s315_s2, 4  ;;  %s241_s21 = smov [#allocation2]   ;;  %s22_s20 = int_to_ptr.hbm [resolvable:$true] %s21_s20 }
   0x2   :  { %s23_s22 = sshll.u32 %s241_s21, 4  ;;  %s242_s23 = smov 128   ;;  %s24_s22 = int_to_ptr.vmem [resolvable:$true] %s23_s22 }
   0x3   :  { %s243_s24 = smov 8  }
   0x4   :  { %29 = dma.hbm_to_vmem [thread:$0]  %s22_s20, 2048, %s24_s22, [#allocation3], %s242_s23, %s242_s23, %s243_s24  }
   0x5   :  { %237 = dma.done.wait [#allocation3], 2048  }
   0x6   :  { %238 = vsyncadd [#allocation3], 4294965248  ;;  %v244_v0 = vmov 0   ;;  %v38_v1 = vld [vmem:[%s313_s0] sm:$0xff]  ;;  %v67_v2 = vld [vmem:[#allocation2 + $0x78] sm:$0xff]  ;;  %v36_v21 = vlaneseq  ;;  %v245_v24 = vmov 1.0  }
   0x7   :  { %186 = vset.pattern.permute.xlu0 %v244_v0  ;;  %187 = vset.pattern.permute.xlu1 %v244_v0  ;;  %v66_v3 = vld [vmem:[#allocation2 + $0x70] sm:$0xff]  ;;  %v65_v4 = vld [vmem:[#allocation2 + $0x68] sm:$0xff]  ;;  %v64_v5 = vld [vmem:[#allocation2 + $0x60] sm:$0xff]  ;;  %v246_v28 = vmov 0.0   ;;  %s138_s11 = sshll.u32 %s317_s4, 4  ;;  %vm129_vm5 = vcmask 7168   ;;  %s139_s11 = int_to_ptr.hbm [resolvable:$true] %s138_s11 }
   0x8   :  { %41 = vperm.xlu0 %186, %v38_v1   ;;  %68 = vmatpush.msra.mxu0 %v67_v2  ;;  %v39_v6 = vld [vmem:[%s313_s0 + $0x8] sm:$0xff]  ;;  %v63_v7 = vld [vmem:[#allocation2 + $0x58] sm:$0xff]  ;;  %v62_v8 = vld [vmem:[#allocation2 + $0x50] sm:$0xff]  ;;  %v37_v22 = vand.u32 127, %v36_v21 }
   0x9   :  { %163 = vmatpush.msra.mxu1 %v67_v2  ;;  %v61_v9 = vld [vmem:[#allocation2 + $0x48] sm:$0xff]  ;;  %v60_v10 = vld [vmem:[#allocation2 + $0x40] sm:$0xff]  ;;  %v59_v11 = vld [vmem:[#allocation2 + $0x38] sm:$0xff] }
   0xa   :  { %69 = vmatpush.msra.mxu0 %v66_v3  ;;  %v58_v12 = vld [vmem:[#allocation2 + $0x30] sm:$0xff]  ;;  %v57_v13 = vld [vmem:[#allocation2 + $0x28] sm:$0xff]  ;;  %v56_v14 = vld [vmem:[#allocation2 + $0x20] sm:$0xff] }
   0xb   :  { %164 = vmatpush.msra.mxu1 %v66_v3  ;;  %v55_v15 = vld [vmem:[#allocation2 + $0x18] sm:$0xff]  ;;  %v54_v16 = vld [vmem:[#allocation2 + $0x10] sm:$0xff]  ;;  %v53_v17 = vld [vmem:[#allocation2 + $0x8] sm:$0xff] }
   0xc   :  { %70 = vmatpush.msra.mxu0 %v65_v4  ;;  %v52_v18 = vld [vmem:[#allocation2] sm:$0xff]  ;;  %v94_v20 = vld [vmem:[%s314_s1 + $0x8] sm:$0xff] }
   0xd   :  { %165 = vmatpush.msra.mxu1 %v65_v4  ;;  %v93_v19 = vld [vmem:[%s314_s1] sm:$0xff]  ;;  %s247_s1 = smov [#allocation5]   ;;  %vm96_vm6 = vcmp.ge.s32.totalorder %v94_v20, 0 }
   0xe   :  { %71 = vmatpush.msra.mxu0 %v64_v5  ;;  %102 = vperm.xlu1 %187, %v93_v19   ;;  %v188_v27 = vld [vmem:[%s316_s3] ss:$0 sm:$0xff]  ;;  %s136_s8 = sshll.u32 %s247_s1, 4  ;;  %vm95_vm4 = vcmp.ge.s32.totalorder %v93_v19, 0  ;;  %v160_v45 = vsel %vm96_vm6, 1.0, %v246_v28  ;;  %s137_s8 = int_to_ptr.vmem [resolvable:$true] %s136_s8 }
   0xf   :  { %166 = vmatpush.msra.mxu1 %v64_v5  ;;  %v159_v42 = vsel %vm95_vm4, 1.0, %v246_v28 }
  0x10   :  { %44 = vperm.xlu0 %186, %v39_v6   ;;  %72 = vmatpush.msra.mxu0 %v63_v7 }
  0x11   :  { %167 = vmatpush.msra.mxu1 %v63_v7 }
  0x12   :  { %73 = vmatpush.msra.mxu0 %v62_v8 }
  0x13   :  { %168 = vmatpush.msra.mxu1 %v62_v8 }
  0x14   :  { %74 = vmatpush.msra.mxu0 %v61_v9 }
  0x15   :  { %169 = vmatpush.msra.mxu1 %v61_v9 }
  0x16   :  { %75 = vmatpush.msra.mxu0 %v60_v10  ;;  %105 = vperm.xlu1 %187, %v94_v20  }
  0x17   :  { %170 = vmatpush.msra.mxu1 %v60_v10 }
  0x18   :  { %76 = vmatpush.msra.mxu0 %v59_v11 }
  0x19   :  { %171 = vmatpush.msra.mxu1 %v59_v11 }
  0x1a   :  { %77 = vmatpush.msra.mxu0 %v58_v12 }
  0x1b   :  { %172 = vmatpush.msra.mxu1 %v58_v12 }
  0x1c   :  { %78 = vmatpush.msra.mxu0 %v57_v13 }
  0x1d   :  { %173 = vmatpush.msra.mxu1 %v57_v13 }
  0x1e   :  { %79 = vmatpush.msra.mxu0 %v56_v14 }
  0x1f   :  { %174 = vmatpush.msra.mxu1 %v56_v14 }
  0x20   :  { %80 = vmatpush.msra.mxu0 %v55_v15 }
  0x21   :  { %175 = vmatpush.msra.mxu1 %v55_v15 }
  0x22   :  { %81 = vmatpush.msra.mxu0 %v54_v16 }
  0x23   :  { %176 = vmatpush.msra.mxu1 %v54_v16 }
  0x24   :  { %82 = vmatpush.msra.mxu0 %v53_v17 }
  0x25   :  { %177 = vmatpush.msra.mxu1 %v53_v17 }
  0x26   :  { %83 = vmatpush.msra.mxu0 %v52_v18 }
  0x27   :  { %178 = vmatpush.msra.mxu1 %v52_v18 }
  0x7a   :  { %v42_v23 = vpop.permute.xlu0 %41 }
  0x7b   :  { %vm46_vm0 = vcmp.eq.s32.totalorder %v37_v22, %v42_v23 }
  0x7c   :  { %157 = vmatmul.msk.f32.vlgmr.msra.gmra.mxu0 %vm46_vm0, %v245_v24  ;;  %v155_v29 = vsel %vm46_vm0, 1.0, %v246_v28 }
  0x7d   :  { %v117_v33 = vmul.f32 %v188_v27, %v155_v29 }
  0x80   :  { %v103_v26 = vpop.permute.xlu1 %102 }
  0x81   :  { %vm107_vm2 = vcmp.eq.s32.totalorder %v37_v22, %v103_v26 }
  0x82   :  { %v45_v25 = vpop.permute.xlu0 %44  ;;  %v161_v30 = vsel %vm107_vm2, 1.0, %v246_v28 }
  0x83   :  { %vm47_vm1 = vcmp.eq.s32.totalorder %v37_v22, %v45_v25 }
  0x84   :  { %158 = vmatmul.msk.f32.vlgmr.msra.gmra.mxu1 %vm47_vm1, %v245_v24  ;;  %v156_v36 = vsel %vm47_vm1, 1.0, %v246_v28 }
  0x85   :  { %v118_v39 = vmul.f32 %v188_v27, %v156_v36 }
  0x88   :  { %v106_v34 = vpop.permute.xlu1 %105 }
  0x89   :  { %vm108_vm3 = vcmp.eq.s32.totalorder %v37_v22, %v106_v34 }
  0x8a   :  { %v162_v38 = vsel %vm108_vm3, 1.0, %v246_v28 }
  0xf9   :  { %v85_v31 = vpop.f32.mrf.mxu0 }
  0xfa   :  { %91 = vst [vmem:[#allocation5] sm:$0xff] %v85_v31  ;;  %v119_v32 = vmul.f32 %v161_v30, %v85_v31 }
  0xfc   :  { %v121_v35 = vsub.f32 %v117_v33, %v119_v32 }
  0xfe   :  { %123 = vadd.xlane.f32.xlu2 %v121_v35 }
 0x101   :  { %v88_v37 = vpop.f32.mrf.mxu1 }
 0x102   :  { %92 = vst [vmem:[#allocation5 + $0x8] sm:$0xff] %v88_v37  ;;  %v120_v40 = vmul.f32 %v162_v38, %v88_v37 }
 0x103   :  { %144 = dma.vmem_to_hbm [thread:$0]  %s137_s8, 256, %s139_s11, [#allocation4], %s242_s23, %s242_s23, %s243_s24  }
 0x104   :  { %v122_v41 = vsub.f32 %v118_v39, %v120_v40 }
 0x106   :  { %125 = vadd.xlane.f32.xlu2 %v122_v41 }
 0x171   :  { %v124_v43 = vpop.xlane.xlu2 %123 }
 0x172   :  { %v127_v44 = vmul.f32 %v159_v42, %v124_v43 }
 0x174   :  { %130 = vst.msk [vmem:[%s318_s5] sm:$0xff] %vm129_vm5, %v127_v44 }
 0x179   :  { %v126_v46 = vpop.xlane.xlu2 %125 }
 0x17a   :  { %v128_v47 = vmul.f32 %v160_v45, %v126_v46 }
 0x17c   :  { %131 = vst.msk [vmem:[%s318_s5 + $0x8] sm:$0xff] %vm129_vm5, %v128_v47 }
 0x17d   :  { %239 = dma.done.wait [#allocation4], 256  }
 0x17e   :  { %240 = vsyncadd [#allocation4], 4294967040 }
 0x17f   :  { %153 = vsyncpa [#allocation3], 1 }
 0x180   :  { %154 = vsyncpa [#allocation4], 1 }

</bundles_post_ra>
